<compile_context>
chip_gen: v5e
topology: v5e:2x2
jax: 0.10.0
libtpu: 0.0.40
codegen_flags: <defaults>
</compile_context>

<pallas_src>
import jax
import jax.numpy as jnp
from jax.experimental import pallas as pl
from jax.experimental.pallas import tpu as pltpu

IGNORE_INDEX = -100
_NEG_BIG = -1e30                 # logit value for padded vocab columns (exp -> 0)
_VMEM_CAP = 56 * 1024 * 1024     # v7x physical VMEM is 64 MiB; leave headroom
_TILE_CAP = 48 * 1024 * 1024     # budget for the pipelined tiles themselves


def _round_up(x, m):
    return ((x + m - 1) // m) * m


def ce_online_kernel(h_ref, w_ref, b_ref, tgt_ref, nll_ref, m_scr, l_scr, t_scr):
    """One (row-block, vocab-block) step of fused projection + online-CE.

    h_ref   : (tn, D)  bf16   hidden tile (resident across the vocab axis)
    w_ref   : (D, tv)  bf16   projection weight tile
    b_ref   : (1, tv)  f32    bias tile (padded columns hold -1e30)
    tgt_ref : (tn, 1)  int32  target ids (IGNORE_INDEX for ignored/padded rows)
    nll_ref : (tn, 1)  f32    per-row NLL output (written at last vocab step)
    m/l/t_scr : (tn,1) f32    running max / running sum(exp) / target logit
    """
    j = pl.program_id(1)
    n_vocab = pl.num_programs(1)

    @pl.when(j == 0)
    def _():
        m_scr[...] = jnp.full_like(m_scr, -jnp.inf)
        l_scr[...] = jnp.zeros_like(l_scr)
        t_scr[...] = jnp.zeros_like(t_scr)

    # (tn, D) @ (D, tv) on the MXU, bf16 inputs, f32 accumulation.
    logits = jnp.dot(h_ref[...], w_ref[...],
                     preferred_element_type=jnp.float32) + b_ref[...]
    tn, tv = logits.shape

    # Online logsumexp update (f32 throughout).
    tile_max = jnp.max(logits, axis=-1, keepdims=True)
    m_new = jnp.maximum(m_scr[...], tile_max)
    alpha = jnp.exp(m_scr[...] - m_new)
    l_scr[...] = alpha * l_scr[...] + jnp.sum(jnp.exp(logits - m_new),
                                              axis=-1, keepdims=True)
    m_scr[...] = m_new

    # Target-logit extraction fused into the vocab-tile loop.  The grid offset
    # is folded into the (tn, 1) target instead of adding it to the full
    # (tn, tv) iota (saves a tn*tv int add on the VPU each step).
    tgt = tgt_ref[...]                                        # (tn, 1) int32
    col = jax.lax.broadcasted_iota(jnp.int32, (tn, tv), 1)
    t_scr[...] += jnp.sum(jnp.where(col == (tgt - j * tv), logits, 0.0),
                          axis=-1, keepdims=True)

    @pl.when(j == n_vocab - 1)
    def _():
        valid = (tgt != IGNORE_INDEX).astype(jnp.float32)     # (tn, 1)
        lse = jnp.log(l_scr[...]) + m_scr[...]
        nll_ref[...] = (lse - t_scr[...]) * valid


def prepare_projection(w_out, b_out, *, tv=1024):
    """Pad + cast the output projection ONCE at init (not every forward call).

    Returns (w_pad bf16 (D, V_pad), b_pad f32 (1, V_pad), tv).  Padded vocab
    columns carry zero weight and a -1e30 bias, so exp() underflows to exactly
    0 and they never contribute to the logsumexp or the target gather.
    """
    D, V = w_out.shape
    tv = min(tv, _round_up(V, 128))
    if tv > 256:
        tv = (tv // 256) * 256        # fill the 256-wide MXU on v6e/v7x
    V_pad = _round_up(V, tv)
    w_pad = jnp.pad(w_out, ((0, 0), (0, V_pad - V))).astype(jnp.bfloat16)
    b_pad = jnp.pad(b_out.astype(jnp.float32), (0, V_pad - V),
                    constant_values=_NEG_BIG).reshape(1, V_pad)
    return w_pad, b_pad, tv


def cross_entropy_loss_pallas(hidden, w_pad, b_pad, targets, *, tn=512, tv=1024):
    """hidden: (N, D), w_pad: (D, V_pad) bf16, b_pad: (1, V_pad) f32, targets: (N,).

    Returns scalar mean cross-entropy over targets != IGNORE_INDEX.
      tn: rows per block (tuning knob: ~256 on v5e, 384-512 on v7x, 512-1024 on v6e)
      tv: vocab columns per block (must divide V_pad; halved here only if VMEM-bound)
    """
    N, D = hidden.shape
    V_pad = w_pad.shape[1]
    assert V_pad % tv == 0

    # Keep >= 2 row blocks when possible so the 'parallel' axis shards across
    # v7x's two TensorCores; tn stays a multiple of 8 (sublane granule).
    tn = max(8, min(tn, _round_up((N + 1) // 2, 8)))

    def _tile_bytes(tn_, tv_):
        return (2 * tn_ * D * 2        # hidden, double-buffered bf16
                + 3 * D * tv_ * 2      # weight, triple-buffered bf16
                + 2 * tv_ * 4          # bias, double-buffered f32
                + 2 * tn_ * 4          # targets
                + 2 * tn_ * 4          # per-row NLL output
                + 3 * tn_ * 4)         # m/l/t scratch

    # Shrink tiles only if the pipelined footprint would bust v7x's VMEM.
    while tv > 128 and _tile_bytes(tn, tv) > _TILE_CAP:
        tv //= 2                       # halving keeps tv | V_pad
    while tn > 256 and _tile_bytes(tn, tv) > _TILE_CAP:
        tn = _round_up(tn // 2, 8)

    N_pad = _round_up(N, tn)
    n_row = N_pad // tn
    n_vocab = V_pad // tv

    # Row padding (cheap, O(N*D)): zero hidden + IGNORE_INDEX targets.
    h = jnp.pad(hidden.astype(jnp.bfloat16), ((0, N_pad - N), (0, 0)))
    tgt = jnp.pad(targets.astype(jnp.int32), (0, N_pad - N),
                  constant_values=IGNORE_INDEX).reshape(N_pad, 1)

    cost = pl.CostEstimate(
        flops=int(2 * N_pad * D * V_pad),
        transcendentals=int(N_pad * V_pad),
        bytes_accessed=int(N_pad * D * 2            # hidden, streamed once
                           + n_row * D * V_pad * 2  # W re-streamed per row block
                           + n_row * V_pad * 4      # bias re-streamed per row block
                           + N_pad * 4              # targets
                           + N_pad * 4),            # per-row NLL out
    )

    vmem_limit = int(min(max(2 * _tile_bytes(tn, tv), 32 * 1024 * 1024),
                         _VMEM_CAP))

    grid_spec = pltpu.PrefetchScalarGridSpec(
        num_scalar_prefetch=0,
        grid=(n_row, n_vocab),                    # vocab (reduction) axis last
        in_specs=[
            pl.BlockSpec((tn, D), lambda i, j: (i, 0)),   # hidden tile (bf16)
            pl.BlockSpec((D, tv), lambda i, j: (0, j),    # weight tile (bf16),
                         pipeline_mode=(pl.Buffered(3)    # deeper pipeline: its
                                        if n_vocab >= 3 else None)),  # DMA dominates
            pl.BlockSpec((1, tv), lambda i, j: (0, j)),   # bias tile (f32)
            pl.BlockSpec((tn, 1), lambda i, j: (i, 0)),   # targets
        ],
        out_specs=pl.BlockSpec((tn, 1), lambda i, j: (i, 0)),  # per-row NLL
        scratch_shapes=[pltpu.VMEM((tn, 1), jnp.float32)] * 3,
    )

    nll = pl.pallas_call(
        ce_online_kernel,
        out_shape=jax.ShapeDtypeStruct((N_pad, 1), jnp.float32),
        grid_spec=grid_spec,
        compiler_params=pltpu.CompilerParams(
            dimension_semantics=("parallel", "arbitrary"),  # rows -> megacore
            vmem_limit_bytes=vmem_limit),
        cost_estimate=cost,
    )(h, w_pad, b_pad, tgt)

    num_valid = jnp.sum((targets != IGNORE_INDEX).astype(jnp.float32))
    # Matches torch.nn.functional.cross_entropy: mean over valid targets
    # (NaN if there are zero valid targets, same as PyTorch).
    return (jnp.sum(nll) / num_valid).astype(jnp.float32)


class SyntheticNetParams:
    """Deterministically-initialized parameters of the wrapped net.

    The projection weight/bias are padded & cast for the kernel once here, so
    the forward pass never repeats the (D, V) f32->bf16 pad/cast over HBM.
    """

    def __init__(self, key, vocab, dim, max_seq_len, *, tv=1024):
        k0, k1, k2 = jax.random.split(key, 3)
        self.vocab = vocab
        self.dim = dim
        self.max_seq_len = max_seq_len
        self.tok_emb = jax.random.normal(k0, (vocab, dim), jnp.float32) * 0.02
        self.pos_emb = jax.random.normal(k1, (max_seq_len, dim), jnp.float32) * 0.02
        self.w_out = jax.random.normal(k2, (dim, vocab), jnp.float32) * 0.02
        self.b_out = jnp.zeros((vocab,), jnp.float32)
        self.w_pad, self.b_pad, self.tv = prepare_projection(
            self.w_out, self.b_out, tv=tv)


def x_autoregressive_wrapper_forward(params: SyntheticNetParams, x, *, tn=512):
    """Mirrors XAutoregressiveWrapper.forward: x is (B, T) int32 tokens."""
    xi = x[:, :-1]                      # (B, T-1)
    xo = x[:, 1:]                       # (B, T-1) targets
    B, Tm1 = xi.shape

    # net(xi): embedding + positional (plain-JAX glue, gather not the hot path)
    hidden = params.tok_emb[xi] + params.pos_emb[:Tm1][None, :, :]   # (B, T-1, D)
    hidden = hidden.reshape(B * Tm1, params.dim)
    targets = xo.reshape(B * Tm1)

    # fused logits-projection + cross-entropy in Pallas
    return cross_entropy_loss_pallas(hidden, params.w_pad, params.b_pad,
                                     targets, tn=tn, tv=params.tv)


def _reference_loss(params, x):
    xi, xo = x[:, :-1], x[:, 1:]
    hidden = params.tok_emb[xi] + params.pos_emb[:xi.shape[1]][None]
    logits = hidden @ params.w_out + params.b_out          # (B, T-1, V)
    logp = jax.nn.log_softmax(logits, axis=-1)
    valid = (xo != IGNORE_INDEX)
    gathered = jnp.take_along_axis(
        logp, jnp.clip(xo, 0)[..., None], axis=-1)[..., 0]
    nll = jnp.where(valid, -gathered, 0.0)
    return jnp.sum(nll) / jnp.sum(valid.astype(jnp.float32))


if __name__ == "__main__":
    B, T = 2, 9          # T-1 = 8, N = B*(T-1) = 16 (tn auto-capped to 8 -> 2 row blocks)
    VOCAB, DIM = 128, 32

    key = jax.random.PRNGKey(0)
    k_param, k_tok = jax.random.split(key)
    params = SyntheticNetParams(k_param, vocab=VOCAB, dim=DIM, max_seq_len=T)

    x = jax.random.randint(k_tok, (B, T), 0, VOCAB, dtype=jnp.int32)

    loss = jax.block_until_ready(x_autoregressive_wrapper_forward(params, x))
    ref = jax.block_until_ready(_reference_loss(params, x))

    # bf16 MXU inputs (f32 accumulation) -> allow a slightly looser tolerance.
    assert jnp.allclose(loss, ref, rtol=1e-3, atol=1e-3), (loss, ref)

    print("KERNEL_OK")
</pallas_src>

<mosaic_0001>
module attributes {stable_mosaic.version = 11 : i64} {
  func.func @ce_online_kernel(%arg0: i32, %arg1: i32, %arg2: memref<8x32xbf16, #tpu.memory_space<vmem>>, %arg3: memref<32x128xbf16, #tpu.memory_space<vmem>>, %arg4: memref<1x128xf32, #tpu.memory_space<vmem>>, %arg5: memref<8x1xi32, #tpu.memory_space<vmem>>, %arg6: memref<8x1xf32, #tpu.memory_space<vmem>>, %arg7: memref<8x1xf32, #tpu.memory_space<vmem>>, %arg8: memref<8x1xf32, #tpu.memory_space<vmem>>, %arg9: memref<8x1xf32, #tpu.memory_space<vmem>>) attributes {dimension_semantics = [#tpu.dimension_semantics<parallel>, #tpu.dimension_semantics<arbitrary>], iteration_bounds = array<i64: 2, 1>, scalar_prefetch = 0 : i64, scratch_operands = 3 : i64, tpu.core_type = #tpu.core_type<tc>, window_params = [{transform_indices = @transform_0, window_bounds = array<i64: 8, 32>}, {transform_indices = @transform_1, window_bounds = array<i64: 32, 128>}, {transform_indices = @transform_2, window_bounds = array<i64: 1, 128>}, {transform_indices = @transform_3, window_bounds = array<i64: 8, 1>}, {transform_indices = @transform_4, window_bounds = array<i64: 8, 1>}]} {
    %c0_i32 = arith.constant 0 : i32
    %0 = arith.cmpi eq, %arg1, %c0_i32 : i32
    %1 = arith.extui %0 : i1 to i32
    %c0_i32_0 = arith.constant 0 : i32
    %2 = arith.cmpi ne, %1, %c0_i32_0 : i32
    scf.if %2 {
      %cst_28 = arith.constant 0xFF800000 : f32
      %43 = vector.broadcast %cst_28 : f32 to vector<8x1xf32>
      %c0_29 = arith.constant 0 : index
      %c0_30 = arith.constant 0 : index
      %44 = vector.load %arg7[%c0_29, %c0_30] : memref<8x1xf32, #tpu.memory_space<vmem>>, vector<8x1xf32>
      tpu.vector_store %arg7[%c0_29, %c0_30], %43 {strides = array<i32>} : memref<8x1xf32, #tpu.memory_space<vmem>>, vector<8x1xf32>,
      %cst_31 = arith.constant 0.000000e+00 : f32
      %45 = vector.broadcast %cst_31 : f32 to vector<8x1xf32>
      %c0_32 = arith.constant 0 : index
      %c0_33 = arith.constant 0 : index
      %46 = vector.load %arg8[%c0_32, %c0_33] : memref<8x1xf32, #tpu.memory_space<vmem>>, vector<8x1xf32>
      tpu.vector_store %arg8[%c0_32, %c0_33], %45 {strides = array<i32>} : memref<8x1xf32, #tpu.memory_space<vmem>>, vector<8x1xf32>,
      %cst_34 = arith.constant 0.000000e+00 : f32
      %47 = vector.broadcast %cst_34 : f32 to vector<8x1xf32>
      %c0_35 = arith.constant 0 : index
      %c0_36 = arith.constant 0 : index
      %48 = vector.load %arg9[%c0_35, %c0_36] : memref<8x1xf32, #tpu.memory_space<vmem>>, vector<8x1xf32>
      tpu.vector_store %arg9[%c0_35, %c0_36], %47 {strides = array<i32>} : memref<8x1xf32, #tpu.memory_space<vmem>>, vector<8x1xf32>,
    } else {
    }
    %c0 = arith.constant 0 : index
    %c0_1 = arith.constant 0 : index
    %3 = vector.load %arg2[%c0, %c0_1] : memref<8x32xbf16, #tpu.memory_space<vmem>>, vector<8x32xbf16>
    %c0_2 = arith.constant 0 : index
    %c0_3 = arith.constant 0 : index
    %4 = vector.load %arg3[%c0_2, %c0_3] : memref<32x128xbf16, #tpu.memory_space<vmem>>, vector<32x128xbf16>
    %cst = arith.constant dense<0.000000e+00> : vector<8x128xf32>
    %5 = tpu.matmul %3, %4, %cst {dimension_numbers = #tpu.dot_dimension_numbers<[1], [0], [0], [1], [0, 0, 1, 1], [], []>} : vector<8x32xbf16>, vector<32x128xbf16>, vector<8x128xf32> -> vector<8x128xf32>
    %c0_4 = arith.constant 0 : index
    %c0_5 = arith.constant 0 : index
    %6 = vector.load %arg4[%c0_4, %c0_5] : memref<1x128xf32, #tpu.memory_space<vmem>>, vector<1x128xf32>
    %7 = vector.broadcast %6 : vector<1x128xf32> to vector<8x128xf32>
    %8 = arith.addf %5, %7 : vector<8x128xf32>
    %cst_6 = arith.constant dense<0xFF800000> : vector<8xf32>
    %9 = vector.multi_reduction <maximumf>, %8, %cst_6 [1] : vector<8x128xf32> to vector<8xf32>
    %10 = vector.shape_cast %9 : vector<8xf32> to vector<8x1xf32>
    %c0_7 = arith.constant 0 : index
    %c0_8 = arith.constant 0 : index
    %11 = vector.load %arg7[%c0_7, %c0_8] : memref<8x1xf32, #tpu.memory_space<vmem>>, vector<8x1xf32>
    %12 = arith.maximumf %11, %10 : vector<8x1xf32>
    %c0_9 = arith.constant 0 : index
    %c0_10 = arith.constant 0 : index
    %13 = vector.load %arg7[%c0_9, %c0_10] : memref<8x1xf32, #tpu.memory_space<vmem>>, vector<8x1xf32>
    %14 = arith.subf %13, %12 : vector<8x1xf32>
    %15 = math.exp %14 : vector<8x1xf32>
    %c0_11 = arith.constant 0 : index
    %c0_12 = arith.constant 0 : index
    %16 = vector.load %arg8[%c0_11, %c0_12] : memref<8x1xf32, #tpu.memory_space<vmem>>, vector<8x1xf32>
    %17 = arith.mulf %15, %16 : vector<8x1xf32>
    %18 = vector.broadcast %12 : vector<8x1xf32> to vector<8x128xf32>
    %19 = arith.subf %8, %18 : vector<8x128xf32>
    %20 = math.exp %19 : vector<8x128xf32>
    %cst_13 = arith.constant dense<0.000000e+00> : vector<8xf32>
    %21 = vector.multi_reduction <add>, %20, %cst_13 [1] : vector<8x128xf32> to vector<8xf32>
    %22 = vector.shape_cast %21 : vector<8xf32> to vector<8x1xf32>
    %23 = arith.addf %17, %22 : vector<8x1xf32>
    %c0_14 = arith.constant 0 : index
    %c0_15 = arith.constant 0 : index
    %24 = vector.load %arg8[%c0_14, %c0_15] : memref<8x1xf32, #tpu.memory_space<vmem>>, vector<8x1xf32>
    tpu.vector_store %arg8[%c0_14, %c0_15], %23 {strides = array<i32>} : memref<8x1xf32, #tpu.memory_space<vmem>>, vector<8x1xf32>,
    %c0_16 = arith.constant 0 : index
    %c0_17 = arith.constant 0 : index
    %25 = vector.load %arg7[%c0_16, %c0_17] : memref<8x1xf32, #tpu.memory_space<vmem>>, vector<8x1xf32>
    tpu.vector_store %arg7[%c0_16, %c0_17], %12 {strides = array<i32>} : memref<8x1xf32, #tpu.memory_space<vmem>>, vector<8x1xf32>,
    %c0_18 = arith.constant 0 : index
    %c0_19 = arith.constant 0 : index
    %26 = vector.load %arg5[%c0_18, %c0_19] : memref<8x1xi32, #tpu.memory_space<vmem>>, vector<8x1xi32>
    %27 = tpu.iota {dimensions = array<i32: 1>} : vector<8x128xi32>
    %c0_20 = arith.constant 0 : index
    %c0_21 = arith.constant 0 : index
    %28 = vector.load %arg9[%c0_20, %c0_21] : memref<8x1xf32, #tpu.memory_space<vmem>>, vector<8x1xf32>
    %c128_i32 = arith.constant 128 : i32
    %29 = arith.muli %arg1, %c128_i32 : i32
    %30 = vector.broadcast %29 : i32 to vector<8x1xi32>
    %31 = arith.subi %26, %30 : vector<8x1xi32>
    %32 = vector.broadcast %31 : vector<8x1xi32> to vector<8x128xi32>
    %33 = arith.cmpi eq, %27, %32 : vector<8x128xi32>
    %cst_22 = arith.constant 0.000000e+00 : f32
    %34 = vector.broadcast %cst_22 : f32 to vector<8x128xf32>
    %35 = arith.select %33, %8, %34 : vector<8x128xi1>, vector<8x128xf32>
    %cst_23 = arith.constant dense<0.000000e+00> : vector<8xf32>
    %36 = vector.multi_reduction <add>, %35, %cst_23 [1] : vector<8x128xf32> to vector<8xf32>
    %37 = vector.shape_cast %36 : vector<8xf32> to vector<8x1xf32>
    %38 = arith.addf %28, %37 : vector<8x1xf32>
    %c0_24 = arith.constant 0 : index
    %c0_25 = arith.constant 0 : index
    %39 = vector.load %arg9[%c0_24, %c0_25] : memref<8x1xf32, #tpu.memory_space<vmem>>, vector<8x1xf32>
    tpu.vector_store %arg9[%c0_24, %c0_25], %38 {strides = array<i32>} : memref<8x1xf32, #tpu.memory_space<vmem>>, vector<8x1xf32>,
    %c0_i32_26 = arith.constant 0 : i32
    %40 = arith.cmpi eq, %arg1, %c0_i32_26 : i32
    %41 = arith.extui %40 : i1 to i32
    %c0_i32_27 = arith.constant 0 : i32
    %42 = arith.cmpi ne, %41, %c0_i32_27 : i32
    scf.if %42 {
      %c-100_i32 = arith.constant -100 : i32
      %43 = vector.broadcast %c-100_i32 : i32 to vector<8x1xi32>
      %44 = arith.cmpi ne, %26, %43 : vector<8x1xi32>
      %45 = arith.extui %44 : vector<8x1xi1> to vector<8x1xi32>
      %46 = arith.sitofp %45 : vector<8x1xi32> to vector<8x1xf32>
      %c0_28 = arith.constant 0 : index
      %c0_29 = arith.constant 0 : index
      %47 = vector.load %arg8[%c0_28, %c0_29] : memref<8x1xf32, #tpu.memory_space<vmem>>, vector<8x1xf32>
      %48 = math.log %47 : vector<8x1xf32>
      %c0_30 = arith.constant 0 : index
      %c0_31 = arith.constant 0 : index
      %49 = vector.load %arg7[%c0_30, %c0_31] : memref<8x1xf32, #tpu.memory_space<vmem>>, vector<8x1xf32>
      %50 = arith.addf %48, %49 : vector<8x1xf32>
      %c0_32 = arith.constant 0 : index
      %c0_33 = arith.constant 0 : index
      %51 = vector.load %arg9[%c0_32, %c0_33] : memref<8x1xf32, #tpu.memory_space<vmem>>, vector<8x1xf32>
      %52 = arith.subf %50, %51 : vector<8x1xf32>
      %53 = arith.mulf %52, %46 : vector<8x1xf32>
      %c0_34 = arith.constant 0 : index
      %c0_35 = arith.constant 0 : index
      %54 = vector.load %arg6[%c0_34, %c0_35] : memref<8x1xf32, #tpu.memory_space<vmem>>, vector<8x1xf32>
      tpu.vector_store %arg6[%c0_34, %c0_35], %53 {strides = array<i32>} : memref<8x1xf32, #tpu.memory_space<vmem>>, vector<8x1xf32>,
    } else {
    }
    return
  }
  func.func @transform_0(%arg0: i32, %arg1: i32) -> (i32, i32) {
    %c0_i32 = arith.constant 0 : i32
    %c0_i32_0 = arith.constant 0 : i32
    return %arg0, %c0_i32 : i32, i32
  }
  func.func @transform_1(%arg0: i32, %arg1: i32) -> (i32, i32) {
    %c0_i32 = arith.constant 0 : i32
    %c0_i32_0 = arith.constant 0 : i32
    return %c0_i32, %arg1 : i32, i32
  }
  func.func @transform_2(%arg0: i32, %arg1: i32) -> (i32, i32) {
    %c0_i32 = arith.constant 0 : i32
    %c0_i32_0 = arith.constant 0 : i32
    return %c0_i32, %arg1 : i32, i32
  }
  func.func @transform_3(%arg0: i32, %arg1: i32) -> (i32, i32) {
    %c0_i32 = arith.constant 0 : i32
    %c0_i32_0 = arith.constant 0 : i32
    return %arg0, %c0_i32 : i32, i32
  }
  func.func @transform_4(%arg0: i32, %arg1: i32) -> (i32, i32) {
    %c0_i32 = arith.constant 0 : i32
    %c0_i32_0 = arith.constant 0 : i32
    return %arg0, %c0_i32 : i32, i32
  }
}

</mosaic_0001>

<bundles_post_ra>
// kernel: tpu_custom_call.1
= control target key start
LH: loop header
LB: loop body
LE: loop exit
PB: predicated region body
PF: predicated region fallthrough
CT: control target
= control target key end

     0   :  { %9 = vsyncpa [#allocation6], 0  ;;  %s805_s0 = inlined_call_operand.hbm [shape: bf16[16,32], index: 0, kind: input, shape index: {}]   ;;  %s806_s1 = inlined_call_operand.vmem [shape: bf16[32,128], index: 1, kind: input, shape index: {}]   ;;  %s807_s2 = inlined_call_operand.vmem [shape: f32[1,128], index: 2, kind: input, shape index: {}]   ;;  %s808_s3 = inlined_call_operand.vmem [shape: s32[16,1], index: 3, kind: input, shape index: {}]   ;;  %s809_s4 = inlined_call_operand.vmem [shape: f32[16,1], index: 4, kind: output, shape index: {}]  }
   0x1   :  { %11 = vsyncpa [#allocation6 + $0x1], 0  ;;  %s691_s15 = smov 0   ;;  %s693_s16 = smov 0  }
   0x2   :  { %s695_s17 = smov 0   ;;  %s697_s18 = smov 0  }
   0x3   :  { %s699_s19 = smov 0   ;;  %s701_s20 = smov 0  }
   0x4 LB: > { %s488_s21 = sadd.s32 4294967295, %s661_s20   ;;  %s29_s22 = sadd.s32 1, %s657_s19  ;;  %s661_s20 = sphi %s701_s20, %s17_s20   ;;  %s657_s19 = sphi %s699_s19, %s816_s19   ;;  %s653_s18 = sphi %s697_s18, %s815_s18   ;;  %s649_s17 = sphi %s695_s17, %s814_s17   ;;  %s645_s16 = sphi %s693_s16, %s813_s16   ;;  %s641_s15 = sphi %s691_s15, %s812_s15  }
   0x5   : > { %p31_p0 = scmp.ge.s32.totalorder %s29_s22, 2  ;;  %s36_s23 = sadd.s32 1, %s649_s17 }
   0x6   : > { %p43_p1 = scmp.ne.s32.totalorder %s649_s17, %s645_s16  ;;  %p44_p2 = scmp.eq.s32.totalorder %s661_s20, 0 }
   0x7   : > { %s818_s22 = smov (%p31_p0, %s29_s22), 0  ;;  %p49_p4 = scmp.ne.s32.totalorder %s645_s16, %s641_s15 }
   0x8   : > { %p727_p3 = por %p44_p2, %p43_p1  ;;  %s33_s25 = ssub.s32 %s657_s19, %s818_s22 }
   0x9   : > { %p50_p5 = scmp.eq.s32.totalorder %s488_s21, 0  ;;  %p34_p6 = scmp.eq.s32.totalorder %s33_s25, 0 }
   0xa   : > { %p520_p8 = scmp.lt.s32.totalorder %s661_s20, 2  ;;  %s190_s28 = sand.u32 1, %s649_s17  }
   0xb   : > { %p734_p7 = por %p50_p5, %p49_p4  ;;  %s495_s29 = sshll.u32 %s657_s19, 2 }
   0xc   : > { %s740_s27 = scalar_select %p34_p6, %s649_s17, %s36_s23  }
   0xd   : > { %s494_s30 = sshll.u32 %s190_s28, 2  ;;  %s198_s7 = scalar_lea.hbm %s805_s0, %s495_s29 }
   0xe   : > { %s200_s8 = sshll.u32 %s198_s7, 4  ;;  %s194_s9 = scalar_lea.vmem [#allocation5], %s494_s30  ;;  %s201_s8 = int_to_ptr.hbm [resolvable:$true] %s200_s8 }
   0xf   : > { %s202_s10 = sshll.u32 %s194_s9, 4  ;;  %p517_p9 = pnand %p520_p8, %p727_p3  ;;  %s203_s10 = int_to_ptr.vmem [resolvable:$true] %s202_s10 }
  0x10   : > { %p496_p10 = scmp.ge.s32.totalorder %s661_s20, 1  ;;  %p214_p11 = scmp.lt.s32.totalorder %s661_s20, 3 }
  0x11   : > { %s191_s11 = scalar_lea.sflag [#allocation6], %s190_s28 }
  0x12   : > { %519 = dma.hbm_to_vmem [thread:$0]  (!%p517_p9), %s201_s8, 64, %s203_s10, %s191_s11  }
  0x13   : > { %p215_p12 = pnand %p496_p10, %p214_p11 }
  0x14   : > { %s220_s12 = sand.u32 (!%p215_p12), 1, %s645_s16  }
  0x15   : > { %218 = sbr.rel (%p215_p12) target bundleno = 550 (0x226), region = 36  ;;  %s497_s13 = sshll.u32 (!%p215_p12), %s220_s12, 2 }
  0x16   : > { %s221_s14 = scalar_lea.sflag (!%p215_p12), [#allocation6], %s220_s12  ;;  %s224_s15 = scalar_lea.vmem (!%p215_p12), [#allocation5], %s497_s13 }
  0x1a   : > { %636 = dma.done.wait (%p734_p7), %s221_s14, 64  }
  0x1b   : > { %638 = vsyncadd (%p734_p7), %s221_s14, 4294967232  ;;  %p267_p13 = scmp.lt.s32.totalorder %s653_s18, 1  ;;  %vm280_vm0 = vcmask 7168   ;;  %v663_v0 = vmov 0   ;;  %v664_v1 = vmov 0.0   ;;  %v513_v2 = vld [vmem:[%s806_s1 + $0x8] sm:$0xff]  ;;  %v346_v8 = vlaneseq }
  0x1c   : > { %573 = vset.pattern.permute.xlu1 %v663_v0  ;;  %282 = vst.msk [vmem:[#allocation3] sm:$0xff] %vm280_vm0, %v664_v1  ;;  %572 = vset.pattern.permute.xlu0 %v663_v0  ;;  %v512_v4 = vld [vmem:[%s806_s1] sm:$0xff]  ;;  %v284_v6 = vld [vmem:[%s224_s15] sm:$0xf]  ;;  %vm305_vm2 = vcmask 261120   ;;  %v665_v7 = vmov -inf  }
  0x1d   : > { %s820_s18 = smov (!%p267_p13, %s653_s18), 1  ;;  %283 = vst.msk [vmem:[#allocation4] sm:$0xff] %vm280_vm0, %v664_v1  ;;  %315 = vmatpush.bf16.msra.mxu0 %v513_v2  ;;  %v347_v9 = vand.u32 127, %v346_v8  ;;  %v574_v10 = vld [vmem:[%s807_s2] ss:$0 sm:$0xff] }
  0x1e   : > { %s498_s21 = sshll.u32 %s820_s18, 3  ;;  %281 = vst.msk [vmem:[#allocation2] sm:$0xff] %vm280_vm0, %v665_v7 }
  0x1f   : > { %s270_s25 = scalar_lea.vmem %s808_s3, %s498_s21  ;;  %s274_s9 = scalar_lea.vmem %s809_s4, %s498_s21 }
  0x20   : > { %v345_v3 = vld [vmem:[%s270_s25] sm:$0xff] }
  0x21   : > { %353 = vperm.xlu1 %573, %v345_v3   ;;  %vm364_vm1 = vcmp.ne.s32.totalorder %v345_v3, 4294967196  ;;  %316 = vmatpush.bf16.msra.mxu0 %v512_v4 }
  0x22   : > { %v509_v5 = vsel %vm364_vm1, 1.0, %v664_v1 }
  0x23   : > { %v329_v29 = vld [vmem:[#allocation3] sm:$0xff] }
  0x24   : > { %508 = vmatmul.msk.bf16.vlgmr.msra.gmra.mxu0 %vm305_vm2, %v284_v6  ;;  %v348_v17 = vld [vmem:[#allocation4] sm:$0xff] }
  0x25   : > { %v324_v16 = vld [vmem:[#allocation2] sm:$0xff] }
  0x93   : > { %v354_v11 = vpop.permute.xlu1 %353 }
  0x94   : > { %vm355_vm3 = vcmp.eq.s32.totalorder %v347_v9, %v354_v11 }
  0xa1   : > { %v318_v12 = vpop.f32.mrf.mxu0 }
  0xa2   : > { %v319_v13 = vadd.f32 %v574_v10, %v318_v12 }
  0xa4   : > { %322 = vmax.xlane.f32.xlu0 %v319_v13  ;;  %v356_v14 = vsel %vm355_vm3, %v319_v13, 0.0 }
  0xa5   : > { %357 = vadd.xlane.f32.xlu2 %v356_v14 }
  0xa9   : > { %v320_v15 = vpop.f32.mrf.mxu0 }
 0x117   : > { %v323_v18 = vpop.xlane.xlu0 %322 }
 0x118   : > { %v325_v19 = vmax.f32 %v324_v16, %v323_v18  ;;  %v358_v20 = vpop.xlane.xlu2 %357 }
 0x119   : > { %v359_v21 = vadd.f32 %v358_v20, %v348_v17 }
 0x11a   : > { %v326_v22 = vsub.f32 %v324_v16, %v325_v19  ;;  %344 = vst.msk [vmem:[#allocation2] sm:$0xff] %vm280_vm0, %v325_v19  ;;  %333 = vperm.xlu0 %572, %v325_v19  }
 0x11b   : > { %360 = vst.msk [vmem:[#allocation4] sm:$0xff] %vm280_vm0, %v359_v21 }
 0x11c   : > { %v327_v27 = vmul.f32 1.442695, %v326_v22 }
 0x121   : > { %v370_v36 = vld [vmem:[#allocation2] sm:$0xff] }
 0x122   : > { %v372_v38 = vld [vmem:[#allocation4] sm:$0xff] }
 0x18c   : > { %v334_v23 = vpop.permute.xlu0 %333 }
 0x18d   : > { %v336_v24 = vsub.f32 %v319_v13, %v334_v23 }
 0x18f   : > { %v337_v25 = vmul.f32 1.442695, %v336_v24 }
 0x191   : > { %575 = vpow2.f32 %v337_v25 }
 0x192   : > { %577 = vpow2.f32 %v327_v27 }
 0x197   : > { %v576_v26 = vpop.eup %575 }
 0x198   : > { %339 = vadd.xlane.f32.xlu1 %v576_v26  ;;  %v578_v28 = vpop.eup %577 }
 0x199   : > { %v330_v30 = vmul.f32 %v578_v28, %v329_v29 }
 0x20b   : > { %v340_v31 = vpop.xlane.xlu1 %339 }
 0x20c   : > { %v341_v32 = vadd.f32 %v340_v31, %v330_v30 }
 0x20e   : > { %343 = vst.msk [vmem:[#allocation3] sm:$0xff] %vm280_vm0, %v341_v32 }
 0x215   : > { %v367_v33 = vld [vmem:[#allocation3] sm:$0xff] }
 0x216   : > { %579 = vlog2.f32 %v367_v33 }
 0x21c   : > { %v580_v34 = vpop.eup %579 }
 0x21d   : > { %v369_v35 = vmul.f32 0.6931472, %v580_v34 }
 0x21f   : > { %v371_v37 = vadd.f32 %v370_v36, %v369_v35 }
 0x221   : > { %v373_v39 = vsub.f32 %v371_v37, %v372_v38 }
 0x223   : > { %v374_v40 = vmul.f32 %v509_v5, %v373_v39 }
 0x225   : > { %375 = vst.msk [vmem:[%s274_s9] sm:$0xff] %vm280_vm0, %v374_v40 }
 0x226 PF: > { %s17_s20 = sadd.s32 1, %s661_s20   ;;  %s812_s15 = smov %s645_s16 }
 0x227   : > { %p14_p0 = scmp.ge.s32.totalorder %s17_s20, 4   ;;  %s813_s16 = smov %s649_s17 }
 0x228   : > { %s814_s17 = smov %s740_s27  ;;  %s815_s18 = smov %s657_s19 }
 0x229   : > { %s816_s19 = smov %s818_s22  ;;  %16 = sbr.rel (!%p14_p0) target bundleno = 4 (0x4), region = 93 }
 0x22e   :  { %395 = vsyncpa [#allocation6], 1 }
 0x22f   :  { %397 = vsyncpa [#allocation6 + $0x1], 1 }

</bundles_post_ra>
